<compile_context>
chip_gen: v5e
topology: v5e:2x2
jax: 0.10.0
libtpu: 0.0.40
codegen_flags: <defaults>
</compile_context>

<pallas_src>
import math
from functools import partial

import jax
import jax.numpy as jnp
from jax.experimental import pallas as pl
from jax.experimental.pallas import tpu as pltpu


# ---------------------------------------------------------------------------
# Hardware-aware VMEM budgets
# ---------------------------------------------------------------------------
def _vmem_capacity_bytes():
    try:
        cap = getattr(pltpu.get_tpu_info(), "vmem_capacity_bytes", None)
        if cap:
            return int(cap)
    except Exception:
        pass
    return 64 * 1024 * 1024          # conservative fallback (v7x per-TC VMEM)


def _vmem_limit_bytes(cap):
    # Raise the scoped-VMEM limit above the 16/32 MiB defaults while keeping
    # headroom below physical capacity.
    return int(min(0.75 * cap, 100 * 1024 * 1024))


# ---------------------------------------------------------------------------
# Tile-size helper: largest `align`-aligned divisor of `dim` that is <= target,
# falling back to the full dimension (always a legal block extent).
# ---------------------------------------------------------------------------
def _pick_tile(dim, target, align):
    if dim <= target:
        return dim
    t = (target // align) * align
    while t >= align:
        if dim % t == 0:
            return t
        t -= align
    # TODO(synk): pad/mask a ragged trailing block instead of falling back to
    # the full dimension when `dim` has no aligned divisor <= target.
    return dim


# ---------------------------------------------------------------------------
# Kernel 1: tiled dense (linear) layer  out = x @ W (+ b)
#   grid = (M/tm, Nout/tn, K/tk); K is the reduction axis ("arbitrary").
#   Matmul operands are cast to `compute_dtype` (bf16 by default); the
#   accumulator is always f32.
# ---------------------------------------------------------------------------
def _linear_bias_kernel(x_ref, w_ref, b_ref, o_ref, acc_ref, *, compute_dtype):
    @pl.when(pl.program_id(2) == 0)
    def _():
        acc_ref[...] = jnp.zeros_like(acc_ref)

    acc_ref[...] += jnp.dot(x_ref[...].astype(compute_dtype),
                            w_ref[...].astype(compute_dtype),
                            preferred_element_type=jnp.float32)

    @pl.when(pl.program_id(2) == pl.num_programs(2) - 1)
    def _():
        o_ref[...] = (acc_ref[...] + b_ref[...].astype(jnp.float32)
                      ).astype(o_ref.dtype)


def _linear_nobias_kernel(x_ref, w_ref, o_ref, acc_ref, *, compute_dtype):
    @pl.when(pl.program_id(2) == 0)
    def _():
        acc_ref[...] = jnp.zeros_like(acc_ref)

    acc_ref[...] += jnp.dot(x_ref[...].astype(compute_dtype),
                            w_ref[...].astype(compute_dtype),
                            preferred_element_type=jnp.float32)

    @pl.when(pl.program_id(2) == pl.num_programs(2) - 1)
    def _():
        o_ref[...] = acc_ref[...].astype(o_ref.dtype)


def pallas_linear(x2d, w, b=None, *, compute_dtype=jnp.bfloat16,
                  tm_target=512, tn_target=512, tk_target=512):
    """x2d: (M, K), w: (K, Nout), optional b: (Nout,) -> (M, Nout)."""
    M, K = x2d.shape
    Nout = w.shape[1]

    tm = _pick_tile(M, tm_target, 8)       # sublane-aligned
    tn = _pick_tile(Nout, tn_target, 128)  # lane-aligned
    tk = _pick_tile(K, tk_target, 128)     # lane-aligned
    grid = (M // tm, Nout // tn, K // tk)

    itemsize = jnp.dtype(x2d.dtype).itemsize
    cost = pl.CostEstimate(
        flops=2 * M * K * Nout,
        transcendentals=0,
        bytes_accessed=(M * K + K * Nout + M * Nout
                        + (Nout if b is not None else 0)) * itemsize,
    )

    cap = _vmem_capacity_bytes()
    common = dict(
        out_shape=jax.ShapeDtypeStruct((M, Nout), x2d.dtype),
        grid=grid,
        out_specs=pl.BlockSpec((tm, tn), lambda i, j, k: (i, j)),
        scratch_shapes=[pltpu.VMEM((tm, tn), jnp.float32)],
        compiler_params=pltpu.CompilerParams(
            dimension_semantics=("parallel", "parallel", "arbitrary"),
            vmem_limit_bytes=_vmem_limit_bytes(cap)),
        cost_estimate=cost,
    )
    x_spec = pl.BlockSpec((tm, tk), lambda i, j, k: (i, k))
    w_spec = pl.BlockSpec((tk, tn), lambda i, j, k: (k, j))

    if b is None:
        return pl.pallas_call(
            partial(_linear_nobias_kernel, compute_dtype=compute_dtype),
            in_specs=[x_spec, w_spec], **common
        )(x2d, w)

    b2 = b.reshape(1, Nout)
    b_spec = pl.BlockSpec((1, tn), lambda i, j, k: (0, j))
    return pl.pallas_call(
        partial(_linear_bias_kernel, compute_dtype=compute_dtype),
        in_specs=[x_spec, w_spec, b_spec], **common
    )(x2d, w, b2)


# ---------------------------------------------------------------------------
# Kernel 2: scaled dot-product attention with softmax.
#   q, k, v : (B, N, C) with heads packed on the channel axis (h*D + d).
#   Grid: (B, H/hblk, N/tq).  Per step the kernel sees
#     q_ref: (tq, hblk*D), k_ref/v_ref: (N, hblk*D),
#     o_ref: (tq, hblk*D)  (lane-dense slice of the (B, N, C) output slab),
#     a_ref: (hblk, tq, N) (attention probabilities).
# ---------------------------------------------------------------------------
def _attention_kernel(q_ref, k_ref, v_ref, o_ref, a_ref, *,
                      scale, hblk, head_dim, compute_dtype):
    approx = jnp.dtype(compute_dtype) != jnp.dtype(jnp.float32)

    q_all = q_ref[...].astype(jnp.float32) * scale      # fold scale into q
    k_all = k_ref[...]
    v_all = v_ref[...]

    outs = []
    for h in range(hblk):                                # static unroll over heads
        c0, c1 = h * head_dim, (h + 1) * head_dim
        q_h = q_all[:, c0:c1].astype(compute_dtype)      # (tq, D)
        k_h = k_all[:, c0:c1].astype(compute_dtype)      # (N, D)
        v_h = v_all[:, c0:c1].astype(compute_dtype)      # (N, D)

        # QK^T: contract over D on both operands -- no transpose materialized.
        s = jax.lax.dot_general(q_h, k_h, (((1,), (1,)), ((), ())),
                                preferred_element_type=jnp.float32)   # (tq, N)

        # numerically-stable softmax (f32 math on every generation)
        s = s - jnp.max(s, axis=-1, keepdims=True)
        p = jnp.exp(s)                                    # unnormalized probs
        r = pl.reciprocal(jnp.sum(p, axis=-1, keepdims=True), approx=approx)

        a_ref[h, :, :] = (p * r).astype(a_ref.dtype)

        # normalize AFTER the PV matmul: (p @ v) * r  (tq*D mults vs tq*N).
        o_h = jax.lax.dot_general(p.astype(compute_dtype), v_h,
                                  (((1,), (0,)), ((), ())),
                                  preferred_element_type=jnp.float32)  # (tq, D)
        outs.append(o_h * r)

    # Single lane-dense store of the whole (tq, hblk*D) output row block.
    o_ref[...] = jnp.concatenate(outs, axis=-1).astype(o_ref.dtype)


def _pick_attn_blocks(N, H, D, itemsize, budget_bytes):
    """Pick (hblk, tq) so blocks are layout-legal and fit the VMEM budget."""
    def lane_ok(h):      # last block dim of q/k/v/o is h*D
        return h == H or (h * D) % 128 == 0

    def sub_ok(t):       # second-to-last block dim of q/o/attn is tq
        return t == N or t % 8 == 0

    def vmem_cost(h, t):
        hd = h * D
        kv = 2 * (2 * N * hd) * itemsize        # k + v, double-buffered
        qo = 2 * (2 * t * hd) * itemsize        # q + o, double-buffered
        a = 2 * (h * t * N) * itemsize          # attn block, double-buffered
        tmp = 2 * h * t * N * 4                 # f32 score/prob temporaries
        return kv + qo + a + tmp

    h_cands = sorted({h for h in range(1, H + 1) if H % h == 0 and lane_ok(h)},
                     reverse=True)
    t_cands = sorted({t for t in range(1, N + 1)
                      if N % t == 0 and sub_ok(t) and t <= 512}, reverse=True)
    if not t_cands:
        t_cands = [N]

    for t in t_cands:                # prefer big query tiles (MXU-friendly M)
        for h in h_cands:            # then as many heads as still fit
            if vmem_cost(h, t) <= budget_bytes:
                return h, t
    return h_cands[-1], t_cands[-1]  # smallest-footprint fallback


def pallas_attention(q, k, v, *, num_heads, scale, compute_dtype=jnp.bfloat16):
    """q, k, v: (B, N, C) head-packed -> (out (B, N, C), attn (B, H, N, N))."""
    B, N, C = q.shape
    D = C // num_heads
    itemsize = jnp.dtype(q.dtype).itemsize

    cap = _vmem_capacity_bytes()
    hblk, tq = _pick_attn_blocks(N, num_heads, D, itemsize,
                                 budget_bytes=int(0.40 * cap))
    hd = hblk * D
    n_hgrp = num_heads // hblk
    grid = (B, n_hgrp, N // tq)       # k/v blocks constant along innermost qi

    kernel = partial(_attention_kernel, scale=scale, hblk=hblk,
                     head_dim=D, compute_dtype=compute_dtype)

    cost = pl.CostEstimate(
        flops=4 * B * num_heads * N * N * D,
        transcendentals=B * num_heads * N * N,
        bytes_accessed=(4 * B * N * C + B * num_heads * N * N) * itemsize,
    )

    out, attn = pl.pallas_call(
        kernel,
        out_shape=(
            jax.ShapeDtypeStruct((B, N, C), q.dtype),
            jax.ShapeDtypeStruct((B, num_heads, N, N), q.dtype),
        ),
        grid=grid,
        in_specs=[
            pl.BlockSpec((None, tq, hd), lambda b, hi, qi: (b, qi, hi)),
            pl.BlockSpec((None, N, hd), lambda b, hi, qi: (b, 0, hi)),
            pl.BlockSpec((None, N, hd), lambda b, hi, qi: (b, 0, hi)),
        ],
        out_specs=(
            pl.BlockSpec((None, tq, hd), lambda b, hi, qi: (b, qi, hi)),
            pl.BlockSpec((None, hblk, tq, N), lambda b, hi, qi: (b, hi, qi, 0)),
        ),
        compiler_params=pltpu.CompilerParams(
            dimension_semantics=("parallel", "parallel", "parallel"),
            vmem_limit_bytes=_vmem_limit_bytes(cap)),
        cost_estimate=cost,
    )(q, k, v)
    return out, attn


# ---------------------------------------------------------------------------
# Module-level wrapper (matches PyTorch Attention.forward)
# ---------------------------------------------------------------------------
def attention_forward(x, params, num_heads, compute_dtype=jnp.bfloat16):
    B, N, C = x.shape
    head_dim = C // num_heads
    scale = head_dim ** (-0.5)

    w_qkv = params["w_qkv"]          # (C, 3C)   qkv_bias=False -> no bias
    w_proj = params["w_proj"]        # (C, C)
    b_proj = params["b_proj"]        # (C,)

    x2d = x.reshape(B * N, C)

    # Split the fused QKV weight into per-projection column slices (tiny,
    # contiguous).  Same FLOPs and HBM traffic as one fused matmul, but q/k/v
    # land in HBM already in the (B, N, C) head-packed layout the attention
    # kernel slices -- no (B, N, 3, H, D) transpose round-trip through HBM.
    w_q, w_k, w_v = w_qkv[:, :C], w_qkv[:, C:2 * C], w_qkv[:, 2 * C:]
    q = pallas_linear(x2d, w_q, compute_dtype=compute_dtype).reshape(B, N, C)
    k = pallas_linear(x2d, w_k, compute_dtype=compute_dtype).reshape(B, N, C)
    v = pallas_linear(x2d, w_v, compute_dtype=compute_dtype).reshape(B, N, C)

    # Scaled dot-product attention; output is written lane-dense directly into
    # the (B, N, C) slab, so only a free reshape feeds the proj matmul.
    out, attn = pallas_attention(q, k, v, num_heads=num_heads, scale=scale,
                                 compute_dtype=compute_dtype)

    x_out = pallas_linear(out.reshape(B * N, C), w_proj, b_proj,
                          compute_dtype=compute_dtype).reshape(B, N, C)
    return x_out, attn


# ---------------------------------------------------------------------------
# Pure-JAX reference (for a sanity check)
# ---------------------------------------------------------------------------
def attention_reference(x, params, num_heads):
    B, N, C = x.shape
    head_dim = C // num_heads
    scale = head_dim ** (-0.5)
    qkv = x @ params["w_qkv"]                                        # qkv_bias=False
    qkv = qkv.reshape(B, N, 3, num_heads, head_dim).transpose(2, 0, 3, 1, 4)
    q, k, v = qkv[0], qkv[1], qkv[2]
    attn = (q @ jnp.swapaxes(k, -2, -1)) * scale
    attn = jax.nn.softmax(attn, axis=-1)
    out = (attn @ v).transpose(0, 2, 1, 3).reshape(B, N, C)
    out = out @ params["w_proj"] + params["b_proj"]
    return out, attn


if __name__ == "__main__":
    # Small, module-consistent shapes: B=2, N(seq)=8, C(dim)=32, heads=8
    B, N, C, H = 2, 8, 32, 8

    key = jax.random.PRNGKey(0)
    k_x, k_wqkv, k_wproj, k_bproj = jax.random.split(key, 4)

    x = jax.random.normal(k_x, (B, N, C), dtype=jnp.float32)

    params = {
        # stored as (in_features, out_features); qkv_bias=False -> no qkv bias
        "w_qkv": jax.random.normal(k_wqkv, (C, 3 * C), dtype=jnp.float32)
                 * (1.0 / math.sqrt(C)),
        "w_proj": jax.random.normal(k_wproj, (C, C), dtype=jnp.float32)
                  * (1.0 / math.sqrt(C)),
        "b_proj": jax.random.normal(k_bproj, (C,), dtype=jnp.float32) * 0.01,
    }

    ref_out, ref_attn = attention_reference(x, params, num_heads=H)

    # 1) Exact-numerics path (f32 matmul operands) -- strict tolerances.
    out32, attn32 = attention_forward(x, params, num_heads=H,
                                      compute_dtype=jnp.float32)
    jax.block_until_ready((out32, attn32))
    assert out32.shape == (B, N, C) and attn32.shape == (B, H, N, N)
    assert jnp.allclose(out32, ref_out, atol=1e-4, rtol=1e-4)
    assert jnp.allclose(attn32, ref_attn, atol=1e-5, rtol=1e-5)

    # 2) Fast path (bf16 matmul operands, f32 accumulation & softmax) --
    #    loose tolerances appropriate for bf16 operand rounding.
    outbf, attnbf = attention_forward(x, params, num_heads=H)   # default bf16
    jax.block_until_ready((outbf, attnbf))
    assert outbf.shape == (B, N, C) and attnbf.shape == (B, H, N, N)
    assert jnp.allclose(outbf, ref_out, atol=5e-2, rtol=5e-2)
    assert jnp.allclose(attnbf, ref_attn, atol=2e-2, rtol=5e-2)

    print("KERNEL_OK")
</pallas_src>

<mosaic_0001>
module attributes {stable_mosaic.version = 11 : i64} {
  func.func @_linear_nobias_kernel(%arg0: i32, %arg1: i32, %arg2: i32, %arg3: memref<16x32xf32, #tpu.memory_space<vmem>>, %arg4: memref<32x32xf32, #tpu.memory_space<vmem>>, %arg5: memref<16x32xf32, #tpu.memory_space<vmem>>, %arg6: memref<16x32xf32, #tpu.memory_space<vmem>>) attributes {dimension_semantics = [#tpu.dimension_semantics<parallel>, #tpu.dimension_semantics<parallel>, #tpu.dimension_semantics<arbitrary>], iteration_bounds = array<i64: 1, 1, 1>, scalar_prefetch = 0 : i64, scratch_operands = 1 : i64, tpu.core_type = #tpu.core_type<tc>, window_params = [{transform_indices = @transform_0, window_bounds = array<i64: 16, 32>}, {transform_indices = @transform_1, window_bounds = array<i64: 32, 32>}, {transform_indices = @transform_2, window_bounds = array<i64: 16, 32>}]} {
    %c0_i32 = arith.constant 0 : i32
    %0 = arith.cmpi eq, %arg2, %c0_i32 : i32
    %1 = arith.extui %0 : i1 to i32
    %c0_i32_0 = arith.constant 0 : i32
    %2 = arith.cmpi ne, %1, %c0_i32_0 : i32
    scf.if %2 {
      %cst_10 = arith.constant 0.000000e+00 : f32
      %12 = vector.broadcast %cst_10 : f32 to vector<16x32xf32>
      %c0_11 = arith.constant 0 : index
      %c0_12 = arith.constant 0 : index
      %13 = vector.load %arg6[%c0_11, %c0_12] : memref<16x32xf32, #tpu.memory_space<vmem>>, vector<16x32xf32>
      tpu.vector_store %arg6[%c0_11, %c0_12], %12 {strides = array<i32>} : memref<16x32xf32, #tpu.memory_space<vmem>>, vector<16x32xf32>,
    } else {
    }
    %c0 = arith.constant 0 : index
    %c0_1 = arith.constant 0 : index
    %3 = vector.load %arg6[%c0, %c0_1] : memref<16x32xf32, #tpu.memory_space<vmem>>, vector<16x32xf32>
    %c0_2 = arith.constant 0 : index
    %c0_3 = arith.constant 0 : index
    %4 = vector.load %arg3[%c0_2, %c0_3] : memref<16x32xf32, #tpu.memory_space<vmem>>, vector<16x32xf32>
    %c0_4 = arith.constant 0 : index
    %c0_5 = arith.constant 0 : index
    %5 = vector.load %arg4[%c0_4, %c0_5] : memref<32x32xf32, #tpu.memory_space<vmem>>, vector<32x32xf32>
    %cst = arith.constant dense<0.000000e+00> : vector<16x32xf32>
    %6 = tpu.matmul %4, %5, %cst {dimension_numbers = #tpu.dot_dimension_numbers<[1], [0], [0], [1], [0, 0, 1, 1], [], []>} : vector<16x32xf32>, vector<32x32xf32>, vector<16x32xf32> -> vector<16x32xf32>
    %7 = arith.addf %3, %6 : vector<16x32xf32>
    %c0_6 = arith.constant 0 : index
    %c0_7 = arith.constant 0 : index
    %8 = vector.load %arg6[%c0_6, %c0_7] : memref<16x32xf32, #tpu.memory_space<vmem>>, vector<16x32xf32>
    tpu.vector_store %arg6[%c0_6, %c0_7], %7 {strides = array<i32>} : memref<16x32xf32, #tpu.memory_space<vmem>>, vector<16x32xf32>,
    %c0_i32_8 = arith.constant 0 : i32
    %9 = arith.cmpi eq, %arg2, %c0_i32_8 : i32
    %10 = arith.extui %9 : i1 to i32
    %c0_i32_9 = arith.constant 0 : i32
    %11 = arith.cmpi ne, %10, %c0_i32_9 : i32
    scf.if %11 {
      %c0_10 = arith.constant 0 : index
      %c0_11 = arith.constant 0 : index
      %12 = vector.load %arg6[%c0_10, %c0_11] : memref<16x32xf32, #tpu.memory_space<vmem>>, vector<16x32xf32>
      %c0_12 = arith.constant 0 : index
      %c0_13 = arith.constant 0 : index
      %13 = vector.load %arg5[%c0_12, %c0_13] : memref<16x32xf32, #tpu.memory_space<vmem>>, vector<16x32xf32>
      tpu.vector_store %arg5[%c0_12, %c0_13], %12 {strides = array<i32>} : memref<16x32xf32, #tpu.memory_space<vmem>>, vector<16x32xf32>,
    } else {
    }
    return
  }
  func.func @transform_0(%arg0: i32, %arg1: i32, %arg2: i32) -> (i32, i32) {
    %c0_i32 = arith.constant 0 : i32
    return %arg0, %arg2 : i32, i32
  }
  func.func @transform_1(%arg0: i32, %arg1: i32, %arg2: i32) -> (i32, i32) {
    %c0_i32 = arith.constant 0 : i32
    return %arg2, %arg1 : i32, i32
  }
  func.func @transform_2(%arg0: i32, %arg1: i32, %arg2: i32) -> (i32, i32) {
    %c0_i32 = arith.constant 0 : i32
    return %arg0, %arg1 : i32, i32
  }
}

</mosaic_0001>

<bundles_post_ra>
// kernel: tpu_custom_call.1
= control target key start
LH: loop header
LB: loop body
LE: loop exit
PB: predicated region body
PF: predicated region fallthrough
CT: control target
= control target key end

     0   :  { %7 = vsyncpa [#allocation4], 0  ;;  %s257_s0 = inlined_call_operand.hbm [shape: f32[16,32], index: 0, kind: input, shape index: {}]   ;;  %s258_s1 = inlined_call_operand.hbm [shape: f32[32,32], index: 1, kind: input, shape index: {}]   ;;  %s259_s2 = inlined_call_operand.hbm [shape: f32[16,32], index: 2, kind: output, shape index: {}]  }
   0x1   :  { %8 = vsyncpa [#allocation7], 0 }
   0x2   :  { %9 = vsyncpa [#allocation5], 0  ;;  %s14_s11 = sshll.u32 %s257_s0, 4  ;;  %s210_s12 = smov [#allocation3]   ;;  %s15_s11 = int_to_ptr.hbm [resolvable:$true] %s14_s11 }
   0x3   :  { %s16_s13 = sshll.u32 %s210_s12, 4  ;;  %s27_s16 = sshll.u32 %s258_s1, 4  ;;  %s17_s13 = int_to_ptr.vmem [resolvable:$true] %s16_s13  ;;  %s28_s16 = int_to_ptr.hbm [resolvable:$true] %s27_s16 }
   0x4   :  { %s211_s17 = smov 128   ;;  %s212_s18 = smov 8  }
   0x5   :  { %22 = dma.hbm_to_vmem [thread:$0]  %s15_s11, 256, %s17_s13, [#allocation4], %s211_s17, %s211_s17, %s212_s18  }
   0x6   :  { %s213_s19 = smov [#allocation6]  }
   0x7   :  { %s29_s20 = sshll.u32 %s213_s19, 4  ;;  %s30_s20 = int_to_ptr.vmem [resolvable:$true] %s29_s20 }
   0x8   :  { %35 = dma.hbm_to_vmem [thread:$0]  %s28_s16, 512, %s30_s20, [#allocation7], %s211_s17, %s211_s17, %s212_s18  }
   0x9   :  { %204 = dma.done.wait [#allocation4], 256  }
   0xa   :  { %205 = vsyncadd [#allocation4], 4294967040 }
   0xb   :  { %206 = dma.done.wait [#allocation7], 512  }
   0xc   :  { %207 = vsyncadd [#allocation7], 4294966784  ;;  %vm48_vm0 = vcmask 261120   ;;  %v214_v0 = vmov 0.0   ;;  %v58_v1 = vld [vmem:[#allocation6 + $0x18] sm:$0xff]  ;;  %v57_v2 = vld [vmem:[#allocation6 + $0x10] sm:$0xff] }
   0xd   :  { %49 = vst.msk [vmem:[#allocation2] sm:$0xff] %vm48_vm0, %v214_v0  ;;  %78 = vmatpush.msra.mxu0 %v58_v1  ;;  %122 = vmatpush.msra.mxu1 %v58_v1  ;;  %v56_v3 = vld [vmem:[#allocation6 + $0x8] sm:$0xff]  ;;  %v55_v4 = vld [vmem:[#allocation6] sm:$0xff]  ;;  %v53_v5 = vld [vmem:[#allocation3] sm:$0xff]  ;;  %s215_s0 = smov [#allocation8]   ;;  %s106_s23 = sshll.u32 %s259_s2, 4  ;;  %s107_s23 = int_to_ptr.hbm [resolvable:$true] %s106_s23 }
   0xe   :  { %50 = vst.msk [vmem:[#allocation2 + $0x8] sm:$0xff] %vm48_vm0, %v214_v0  ;;  %v54_v6 = vld [vmem:[#allocation3 + $0x8] sm:$0xff]  ;;  %s104_s1 = sshll.u32 %s215_s0, 4  ;;  %s105_s1 = int_to_ptr.vmem [resolvable:$true] %s104_s1 }
   0xf   :  { %79 = vmatpush.msra.mxu0 %v57_v2  ;;  %123 = vmatpush.msra.mxu1 %v57_v2 }
  0x11   :  { %80 = vmatpush.msra.mxu0 %v56_v3  ;;  %124 = vmatpush.msra.mxu1 %v56_v3 }
  0x13   :  { %81 = vmatpush.msra.mxu0 %v55_v4  ;;  %125 = vmatpush.msra.mxu1 %v55_v4 }
  0x14   :  { %120 = vmatmul.msk.f32.vlgmr.msra.gmra.mxu0 %vm48_vm0, %v53_v5  ;;  %121 = vmatmul.msk.f32.vlgmr.msra.gmra.mxu1 %vm48_vm0, %v54_v6  ;;  %v51_v7 = vld [vmem:[#allocation2] sm:$0xff] }
  0x15   :  { %v52_v8 = vld [vmem:[#allocation2 + $0x8] sm:$0xff] }
  0x91   :  { %v83_v9 = vpop.f32.mrf.mxu0  ;;  %v86_v10 = vpop.f32.mrf.mxu1 }
  0x92   :  { %v89_v11 = vadd.f32 %v83_v9, %v51_v7  ;;  %v90_v12 = vadd.f32 %v86_v10, %v52_v8 }
  0x94   :  { %91 = vst.msk [vmem:[#allocation2] sm:$0xff] %vm48_vm0, %v89_v11 }
  0x95   :  { %92 = vst.msk [vmem:[#allocation2 + $0x8] sm:$0xff] %vm48_vm0, %v90_v12 }
  0x9b   :  { %v96_v13 = vld [vmem:[#allocation2] sm:$0xff] }
  0x9c   :  { %v97_v14 = vld [vmem:[#allocation2 + $0x8] sm:$0xff]  ;;  %98 = vst.msk [vmem:[#allocation8] sm:$0xff] %vm48_vm0, %v96_v13 }
  0x9d   :  { %99 = vst.msk [vmem:[#allocation8 + $0x8] sm:$0xff] %vm48_vm0, %v97_v14 }
  0x9e   :  { %112 = dma.vmem_to_hbm [thread:$0]  %s105_s1, 256, %s107_s23, [#allocation5], %s211_s17, %s211_s17, %s212_s18  }
  0x9f   :  { %208 = dma.done.wait [#allocation5], 256  }
  0xa0   :  { %209 = vsyncadd [#allocation5], 4294967040 }
  0xa1   :  { %117 = vsyncpa [#allocation4], 1 }
  0xa2   :  { %118 = vsyncpa [#allocation7], 1 }
  0xa3   :  { %119 = vsyncpa [#allocation5], 1 }

</bundles_post_ra>
